<compile_context>
chip_gen: v5e
topology: v5e:2x2
jax: 0.10.0
libtpu: 0.0.40
codegen_flags: <defaults>
</compile_context>

<pallas_src>
import math
import functools

import numpy as np
import jax
import jax.numpy as jnp
from jax.experimental import pallas as pl
from jax.experimental.pallas import tpu as pltpu

LANE = 128     # lane width: hidden feature dims are padded (once) to a multiple of this
SUBLANE = 8


def _round_up(x, m):
    return ((x + m - 1) // m) * m


@functools.lru_cache(maxsize=1)
def _tpu_generation_info():
    """(vmem_capacity_bytes, tensorcores_per_chip, has_bf16_vpu) -- one-time query."""
    kind = ""
    try:
        kind = jax.devices()[0].device_kind.lower()
    except Exception:
        pass
    vmem_cap = 128 * 1024 * 1024
    num_cores = 1
    bf16_vpu = True
    if "v5 lite" in kind or "v5e" in kind or "v5lite" in kind:
        bf16_vpu = False                       # v5e has no bf16 VALU -> f32 epilogue
    if "v7" in kind:
        vmem_cap = 64 * 1024 * 1024            # v7x: 64 MiB VMEM per TensorCore
        num_cores = 2                          # 2 TensorCores per chip
    try:
        vmem_cap = int(pltpu.get_tpu_info().vmem_capacity_bytes)
    except Exception:
        pass
    return vmem_cap, num_cores, bf16_vpu


@functools.lru_cache(maxsize=1)
def _single_buffer_supported():
    """One-time, cached capability check for single-buffered (Buffered(1)) blocks."""
    if not hasattr(pl, "Buffered"):
        return False

    def _copy_kernel(x_ref, o_ref):
        o_ref[...] = x_ref[...]

    try:
        fn = pl.pallas_call(
            _copy_kernel,
            out_shape=jax.ShapeDtypeStruct((SUBLANE, LANE), jnp.float32),
            grid_spec=pltpu.PrefetchScalarGridSpec(
                num_scalar_prefetch=0,
                grid=(1,),
                in_specs=[pl.BlockSpec((SUBLANE, LANE), lambda i: (0, 0),
                                       pipeline_mode=pl.Buffered(1))],
                out_specs=pl.BlockSpec((SUBLANE, LANE), lambda i: (0, 0)),
            ),
        )
        jax.jit(fn).lower(
            jax.ShapeDtypeStruct((SUBLANE, LANE), jnp.float32)).compile()
        return True
    except Exception:
        return False


def _leaky_relu(h):
    # LeakyReLU(0.2): max(h, 0.2*h) -> one vmul + one vmax.
    return jnp.maximum(h, 0.2 * h)


def _ae_kernel(x_ref, w1_ref, b1_ref, w2_ref, b2_ref, w3_ref, b3_ref, o_ref):
    # Layer 1: cast the f32 x tile to bf16 in-register (avoids a separate HBM pre-cast
    # pass), MXU matmul with f32 accumulation.
    x = x_ref[...].astype(w1_ref.dtype)
    h = jnp.dot(x, w1_ref[...], preferred_element_type=jnp.float32)
    # Bias + LeakyReLU epilogue in the bias dtype (bf16 on v6e/v7x, f32 on v5e).
    h = _leaky_relu(h.astype(b1_ref.dtype) + b1_ref[...])

    # Layer 2
    h = jnp.dot(h.astype(w2_ref.dtype), w2_ref[...],
                preferred_element_type=jnp.float32)
    h = _leaky_relu(h.astype(b2_ref.dtype) + b2_ref[...])

    # Layer 3 (no activation); final bias add in f32, single cast to the output dtype.
    out = jnp.dot(h.astype(w3_ref.dtype), w3_ref[...],
                  preferred_element_type=jnp.float32)
    o_ref[...] = (out + b3_ref[...]).astype(o_ref.dtype)


@functools.partial(jax.jit,
                   static_argnames=("block_m", "single_buffer", "out_dtype",
                                    "vmem_limit"))
def _ae_forward(x, w1, b1, w2, b2, w3, b3, *, block_m, single_buffer, out_dtype,
                vmem_limit):
    B, in_d = x.shape
    hid_p = w1.shape[1]
    out_d = w3.shape[1]
    grid = (pl.cdiv(B, block_m),)

    res_kwargs = {"pipeline_mode": pl.Buffered(1)} if single_buffer else {}

    def resident(shape):
        # Grid-invariant weights / biases: fetched once, resident in VMEM.
        return pl.BlockSpec(shape, lambda i: (0, 0), **res_kwargs)

    return pl.pallas_call(
        _ae_kernel,
        out_shape=jax.ShapeDtypeStruct((B, out_d), out_dtype),
        grid_spec=pltpu.PrefetchScalarGridSpec(
            num_scalar_prefetch=0,
            grid=grid,
            in_specs=[
                # x: tiled over the batch ("parallel"); feature dim is a full-extent
                # block, so no per-call lane padding of x is ever needed.
                pl.BlockSpec((block_m, in_d), lambda i: (i, 0)),
                resident((in_d, hid_p)),
                resident((1, hid_p)),
                resident((hid_p, hid_p)),
                resident((1, hid_p)),
                resident((hid_p, out_d)),
                resident((1, out_d)),
            ],
            out_specs=pl.BlockSpec((block_m, out_d), lambda i: (i, 0)),
        ),
        compiler_params=pltpu.CompilerParams(
            dimension_semantics=("parallel",),
            vmem_limit_bytes=vmem_limit,
        ),
    )(x, w1, b1, w2, b2, w3, b3)


def prepare_ae_params(w1, b1, w2, b2, w3, b3):
    """One-time (per parameter set) padding + casting, hoisted out of the forward.

    Weights are stored (fan_in, fan_out); only the *hidden* dims are zero-padded to a
    lane multiple (exact: zero weight rows/cols + zero bias contribute nothing through
    LeakyReLU). Weights -> bf16 (f32 accumulation in-kernel); hidden biases -> bf16 on
    chips with a bf16 VPU (bf16 epilogue), f32 otherwise; final bias stays f32.
    """
    in_dims, hid_dims = w1.shape
    out_dims = w3.shape[1]
    hid_p = _round_up(hid_dims, LANE)

    _, _, bf16_vpu = _tpu_generation_info()
    bias_dtype = jnp.bfloat16 if bf16_vpu else jnp.float32

    def pad2(a, rows, cols, dtype):
        buf = jnp.zeros((rows, cols), dtype)
        return buf.at[: a.shape[0], : a.shape[1]].set(a.astype(dtype))

    w1p = pad2(w1, in_dims, hid_p, jnp.bfloat16)
    w2p = pad2(w2, hid_p, hid_p, jnp.bfloat16)
    w3p = pad2(w3, hid_p, out_dims, jnp.bfloat16)
    b1p = pad2(b1, 1, hid_p, bias_dtype)
    b2p = pad2(b2, 1, hid_p, bias_dtype)
    b3p = pad2(b3, 1, out_dims, jnp.float32)
    padded = jax.block_until_ready((w1p, b1p, w2p, b2p, w3p, b3p))
    meta = (in_dims, hid_dims, out_dims, hid_p)
    return padded + (meta,)


def _select_config(B, in_dims, hid_p, out_dims, out_dtype, requested_block_m):
    vmem_cap, num_cores, _ = _tpu_generation_info()
    # ~96 MiB budget on 128 MiB chips (v5e/v6e), ~48 MiB on v7x's 64 MiB VMEM.
    budget = int(min(vmem_cap * 3 // 4, 96 * 1024 * 1024))

    # Resident (single-buffered) weights + biases (f32-bias upper bound).
    weight_bytes = (2 * (in_dims * hid_p + hid_p * hid_p + hid_p * out_dims)
                    + 4 * (2 * hid_p + out_dims))
    out_itemsize = np.dtype(out_dtype).itemsize

    def tile_bytes(m):
        x_tile = 2 * m * in_dims * 4               # f32 x tile, double-buffered
        o_tile = 2 * m * out_dims * out_itemsize   # output tile, double-buffered
        h_live = 2 * m * hid_p * 4                 # live intermediates (f32 upper bound)
        return x_tile + o_tile + h_live

    bm = 512 if requested_block_m is None else requested_block_m
    bm = max(LANE, _round_up(bm, LANE))
    bm = min(bm, _round_up(B, LANE))

    # Shrink the batch tile until resident weights + streaming tiles fit the budget.
    while bm > SUBLANE and weight_bytes + tile_bytes(bm) > budget:
        bm = max(SUBLANE, (bm // 2) // SUBLANE * SUBLANE)
    # TODO(synk): if weight_bytes alone exceeds the budget (very large hid_dims,
    # especially on v7x's 64 MiB VMEM), switch to a hid-tiled "arbitrary" grid axis
    # with a VMEM accumulator instead of fully-resident weights.

    # v7x (2 TensorCores): make sure the "parallel" batch axis has >= num_cores steps
    # whenever the batch allows it, so both cores get work.
    while num_cores > 1 and bm > SUBLANE and pl.cdiv(B, bm) < num_cores:
        bm = max(SUBLANE, (bm // 2) // SUBLANE * SUBLANE)

    if bm >= B:
        bm = B   # one full-extent batch block (always a legal block shape)

    return bm, budget


def ae_layer_forward(x, prepared_params, *, block_m=None, out_dtype=jnp.float32):
    """Fused AELayer forward.

    x: (B, in_dims) float32 (cast to bf16 inside the kernel)
    prepared_params: result of prepare_ae_params(...)
    Returns (B, out_dims) in `out_dtype` (f32 default; bf16 halves HBM writeback).
    """
    w1p, b1p, w2p, b2p, w3p, b3p, meta = prepared_params
    in_dims, hid_dims, out_dims, hid_p = meta
    B = x.shape[0]
    assert x.shape[1] == in_dims, "x feature dim does not match prepared params"

    bm, vmem_limit = _select_config(B, in_dims, hid_p, out_dims, out_dtype, block_m)
    return _ae_forward(x, w1p, b1p, w2p, b2p, w3p, b3p,
                       block_m=bm,
                       single_buffer=_single_buffer_supported(),
                       out_dtype=out_dtype,
                       vmem_limit=vmem_limit)


def init_ae_params(key, in_dims, out_dims, dtype=jnp.float32):
    """Matches the PyTorch module: weight ~ U(-1/sqrt(fan_in), 1/sqrt(fan_in)),
    bias = 0. Weights stored transposed (fan_in, fan_out) so the kernel computes
    y = x @ W + b (== PyTorch's x @ W.T + b)."""
    hid_dims = (in_dims + out_dims) // 2
    k1, k2, k3 = jax.random.split(key, 3)

    def lin(k, fan_in, fan_out):
        stdv = 1.0 / math.sqrt(fan_in)
        w = jax.random.uniform(k, (fan_in, fan_out), dtype=dtype,
                               minval=-stdv, maxval=stdv)
        b = jnp.zeros((1, fan_out), dtype=dtype)
        return w, b

    w1, b1 = lin(k1, in_dims, hid_dims)
    w2, b2 = lin(k2, hid_dims, hid_dims)
    w3, b3 = lin(k3, hid_dims, out_dims)
    return (w1, b1, w2, b2, w3, b3)


def ae_layer_ref(x, w1, b1, w2, b2, w3, b3):
    """Pure-JAX f32 reference (mirrors the PyTorch forward)."""
    def lrelu(v):
        return jnp.where(v > 0, v, 0.2 * v)
    h = lrelu(x @ w1 + b1)
    h = lrelu(h @ w2 + b2)
    return h @ w3 + b3


if __name__ == "__main__":
    in_dims, out_dims = 32, 16          # hid_dims = (32 + 16) // 2 = 24
    batch = 8

    key = jax.random.PRNGKey(0)
    k_x, k_p = jax.random.split(key)
    x = jax.random.normal(k_x, (batch, in_dims), dtype=jnp.float32)
    params = init_ae_params(k_p, in_dims, out_dims)

    # One-time padding / casting of the parameters (hoisted out of the per-call path).
    prepared = prepare_ae_params(*params)

    out = ae_layer_forward(x, prepared)
    out = jax.block_until_ready(out)

    ref = ae_layer_ref(x, *params)
    assert out.shape == (batch, out_dims)
    # bf16 matmuls / epilogue with f32 accumulation -> loose tolerance vs f32 reference.
    assert jnp.allclose(out, ref, atol=5e-2, rtol=5e-2), "mismatch vs reference"

    print("KERNEL_OK")
</pallas_src>

<mosaic_0001>
module attributes {stable_mosaic.version = 11 : i64} {
  func.func @_ae_kernel(%arg0: i32, %arg1: memref<8x32xf32, #tpu.memory_space<vmem>>, %arg2: memref<32x128xbf16, #tpu.memory_space<vmem>>, %arg3: memref<1x128xbf16, #tpu.memory_space<vmem>>, %arg4: memref<128x128xbf16, #tpu.memory_space<vmem>>, %arg5: memref<1x128xbf16, #tpu.memory_space<vmem>>, %arg6: memref<128x16xbf16, #tpu.memory_space<vmem>>, %arg7: memref<1x16xf32, #tpu.memory_space<vmem>>, %arg8: memref<8x16xf32, #tpu.memory_space<vmem>>) attributes {dimension_semantics = [#tpu.dimension_semantics<parallel>], iteration_bounds = array<i64: 1>, scalar_prefetch = 0 : i64, scratch_operands = 0 : i64, tpu.core_type = #tpu.core_type<tc>, window_params = [{transform_indices = @transform_0, window_bounds = array<i64: 8, 32>}, {pipeline_mode = #tpu.pipeline_mode<synchronous>, transform_indices = @transform_1, window_bounds = array<i64: 32, 128>}, {pipeline_mode = #tpu.pipeline_mode<synchronous>, transform_indices = @transform_2, window_bounds = array<i64: 1, 128>}, {pipeline_mode = #tpu.pipeline_mode<synchronous>, transform_indices = @transform_3, window_bounds = array<i64: 128, 128>}, {pipeline_mode = #tpu.pipeline_mode<synchronous>, transform_indices = @transform_4, window_bounds = array<i64: 1, 128>}, {pipeline_mode = #tpu.pipeline_mode<synchronous>, transform_indices = @transform_5, window_bounds = array<i64: 128, 16>}, {pipeline_mode = #tpu.pipeline_mode<synchronous>, transform_indices = @transform_6, window_bounds = array<i64: 1, 16>}, {transform_indices = @transform_7, window_bounds = array<i64: 8, 16>}]} {
    %c0 = arith.constant 0 : index
    %c0_0 = arith.constant 0 : index
    %0 = vector.load %arg1[%c0, %c0_0] : memref<8x32xf32, #tpu.memory_space<vmem>>, vector<8x32xf32>
    %1 = arith.truncf %0 : vector<8x32xf32> to vector<8x32xbf16>
    %c0_1 = arith.constant 0 : index
    %c0_2 = arith.constant 0 : index
    %2 = vector.load %arg2[%c0_1, %c0_2] : memref<32x128xbf16, #tpu.memory_space<vmem>>, vector<32x128xbf16>
    %cst = arith.constant dense<0.000000e+00> : vector<8x128xf32>
    %3 = tpu.matmul %1, %2, %cst {dimension_numbers = #tpu.dot_dimension_numbers<[1], [0], [0], [1], [0, 0, 1, 1], [], []>} : vector<8x32xbf16>, vector<32x128xbf16>, vector<8x128xf32> -> vector<8x128xf32>
    %4 = arith.truncf %3 : vector<8x128xf32> to vector<8x128xbf16>
    %c0_3 = arith.constant 0 : index
    %c0_4 = arith.constant 0 : index
    %5 = vector.load %arg3[%c0_3, %c0_4] : memref<1x128xbf16, #tpu.memory_space<vmem>>, vector<1x128xbf16>
    %6 = vector.broadcast %5 : vector<1x128xbf16> to vector<8x128xbf16>
    %7 = arith.addf %4, %6 : vector<8x128xbf16>
    %cst_5 = arith.constant 2.001950e-01 : bf16
    %8 = vector.broadcast %cst_5 : bf16 to vector<8x128xbf16>
    %9 = arith.mulf %8, %7 : vector<8x128xbf16>
    %10 = arith.maximumf %7, %9 : vector<8x128xbf16>
    %c0_6 = arith.constant 0 : index
    %c0_7 = arith.constant 0 : index
    %11 = vector.load %arg4[%c0_6, %c0_7] : memref<128x128xbf16, #tpu.memory_space<vmem>>, vector<128x128xbf16>
    %cst_8 = arith.constant dense<0.000000e+00> : vector<8x128xf32>
    %12 = tpu.matmul %10, %11, %cst_8 {dimension_numbers = #tpu.dot_dimension_numbers<[1], [0], [0], [1], [0, 0, 1, 1], [], []>} : vector<8x128xbf16>, vector<128x128xbf16>, vector<8x128xf32> -> vector<8x128xf32>
    %13 = arith.truncf %12 : vector<8x128xf32> to vector<8x128xbf16>
    %c0_9 = arith.constant 0 : index
    %c0_10 = arith.constant 0 : index
    %14 = vector.load %arg5[%c0_9, %c0_10] : memref<1x128xbf16, #tpu.memory_space<vmem>>, vector<1x128xbf16>
    %15 = vector.broadcast %14 : vector<1x128xbf16> to vector<8x128xbf16>
    %16 = arith.addf %13, %15 : vector<8x128xbf16>
    %cst_11 = arith.constant 2.001950e-01 : bf16
    %17 = vector.broadcast %cst_11 : bf16 to vector<8x128xbf16>
    %18 = arith.mulf %17, %16 : vector<8x128xbf16>
    %19 = arith.maximumf %16, %18 : vector<8x128xbf16>
    %c0_12 = arith.constant 0 : index
    %c0_13 = arith.constant 0 : index
    %20 = vector.load %arg6[%c0_12, %c0_13] : memref<128x16xbf16, #tpu.memory_space<vmem>>, vector<128x16xbf16>
    %cst_14 = arith.constant dense<0.000000e+00> : vector<8x16xf32>
    %21 = tpu.matmul %19, %20, %cst_14 {dimension_numbers = #tpu.dot_dimension_numbers<[1], [0], [0], [1], [0, 0, 1, 1], [], []>} : vector<8x128xbf16>, vector<128x16xbf16>, vector<8x16xf32> -> vector<8x16xf32>
    %c0_15 = arith.constant 0 : index
    %c0_16 = arith.constant 0 : index
    %22 = vector.load %arg7[%c0_15, %c0_16] : memref<1x16xf32, #tpu.memory_space<vmem>>, vector<1x16xf32>
    %23 = vector.broadcast %22 : vector<1x16xf32> to vector<8x16xf32>
    %24 = arith.addf %21, %23 : vector<8x16xf32>
    %c0_17 = arith.constant 0 : index
    %c0_18 = arith.constant 0 : index
    %25 = vector.load %arg8[%c0_17, %c0_18] : memref<8x16xf32, #tpu.memory_space<vmem>>, vector<8x16xf32>
    tpu.vector_store %arg8[%c0_17, %c0_18], %24 {strides = array<i32>} : memref<8x16xf32, #tpu.memory_space<vmem>>, vector<8x16xf32>,
    return
  }
  func.func @transform_0(%arg0: i32) -> (i32, i32) {
    %c0_i32 = arith.constant 0 : i32
    %c0_i32_0 = arith.constant 0 : i32
    return %arg0, %c0_i32 : i32, i32
  }
  func.func @transform_1(%arg0: i32) -> (i32, i32) {
    %c0_i32 = arith.constant 0 : i32
    %c0_i32_0 = arith.constant 0 : i32
    %c0_i32_1 = arith.constant 0 : i32
    return %c0_i32, %c0_i32_0 : i32, i32
  }
  func.func @transform_2(%arg0: i32) -> (i32, i32) {
    %c0_i32 = arith.constant 0 : i32
    %c0_i32_0 = arith.constant 0 : i32
    %c0_i32_1 = arith.constant 0 : i32
    return %c0_i32, %c0_i32_0 : i32, i32
  }
  func.func @transform_3(%arg0: i32) -> (i32, i32) {
    %c0_i32 = arith.constant 0 : i32
    %c0_i32_0 = arith.constant 0 : i32
    %c0_i32_1 = arith.constant 0 : i32
    return %c0_i32, %c0_i32_0 : i32, i32
  }
  func.func @transform_4(%arg0: i32) -> (i32, i32) {
    %c0_i32 = arith.constant 0 : i32
    %c0_i32_0 = arith.constant 0 : i32
    %c0_i32_1 = arith.constant 0 : i32
    return %c0_i32, %c0_i32_0 : i32, i32
  }
  func.func @transform_5(%arg0: i32) -> (i32, i32) {
    %c0_i32 = arith.constant 0 : i32
    %c0_i32_0 = arith.constant 0 : i32
    %c0_i32_1 = arith.constant 0 : i32
    return %c0_i32, %c0_i32_0 : i32, i32
  }
  func.func @transform_6(%arg0: i32) -> (i32, i32) {
    %c0_i32 = arith.constant 0 : i32
    %c0_i32_0 = arith.constant 0 : i32
    %c0_i32_1 = arith.constant 0 : i32
    return %c0_i32, %c0_i32_0 : i32, i32
  }
  func.func @transform_7(%arg0: i32) -> (i32, i32) {
    %c0_i32 = arith.constant 0 : i32
    %c0_i32_0 = arith.constant 0 : i32
    return %arg0, %c0_i32 : i32, i32
  }
}

</mosaic_0001>

<bundles_post_ra>
// kernel: _ae_forward.1
= control target key start
LH: loop header
LB: loop body
LE: loop exit
PB: predicated region body
PF: predicated region fallthrough
CT: control target
= control target key end

     0   :  { %12 = vsyncpa [#allocation3], 0  ;;  %s546_s0 = inlined_call_operand.vmem [shape: f32[8,32], index: 0, kind: input, shape index: {}]   ;;  %s547_s1 = inlined_call_operand.hbm [shape: bf16[32,128], index: 1, kind: input, shape index: {}]   ;;  %s548_s2 = inlined_call_operand.vmem [shape: bf16[1,128], index: 2, kind: input, shape index: {}]   ;;  %s549_s3 = inlined_call_operand.vmem [shape: bf16[128,128], index: 3, kind: input, shape index: {}]   ;;  %s550_s4 = inlined_call_operand.vmem [shape: bf16[1,128], index: 4, kind: input, shape index: {}]   ;;  %s551_s5 = inlined_call_operand.vmem [shape: bf16[128,16], index: 5, kind: input, shape index: {}]   ;;  %s552_s6 = inlined_call_operand.vmem [shape: f32[1,16], index: 6, kind: input, shape index: {}]   ;;  %s553_s7 = inlined_call_operand.hbm [shape: f32[8,16], index: 7, kind: output, shape index: {}]  }
   0x1   :  { %13 = vsyncpa [#allocation4], 0  ;;  %s20_s26 = sshll.u32 %s547_s1, 4  ;;  %s436_s27 = smov [#allocation2]   ;;  %s21_s26 = int_to_ptr.hbm [resolvable:$true] %s20_s26 }
   0x2   :  { %s22_s28 = sshll.u32 %s436_s27, 4  ;;  %s437_s29 = smov 64   ;;  %s23_s28 = int_to_ptr.vmem [resolvable:$true] %s22_s28 }
   0x3   :  { %s438_s30 = smov 4  }
   0x4   :  { %28 = dma.hbm_to_vmem [thread:$0]  %s21_s26, 256, %s23_s28, [#allocation3], %s437_s29, %s437_s29, %s438_s30  }
   0x5   :  { %432 = dma.done.wait [#allocation3], 256  }
   0x6   :  { %433 = vsyncadd [#allocation3], 4294967040  ;;  %v362_v0 = vld [vmem:[#allocation2 + $0x8] sm:$0xff]  ;;  %v370_v1 = vld [vmem:[%s549_s3 + $0x38] sm:$0xff]  ;;  %vm62_vm0 = vcmask 261120   ;;  %s439_s18 = smov [#allocation5]  }
   0x7   :  { %72 = vmatpush.bf16.msra.mxu0 %v362_v0  ;;  %v361_v2 = vld [vmem:[#allocation2] sm:$0xff]  ;;  %159 = vmatpush.bf16.msra.mxu1 %v370_v1  ;;  %v369_v4 = vld [vmem:[%s549_s3 + $0x30] sm:$0xff]  ;;  %v368_v6 = vld [vmem:[%s549_s3 + $0x28] sm:$0xff]  ;;  %s278_s21 = sshll.u32 %s553_s7, 4  ;;  %vm269_vm1 = vcmask 130048   ;;  %s279_s21 = int_to_ptr.hbm [resolvable:$true] %s278_s21 }
   0x8   :  { %v44_v3 = vld [vmem:[%s546_s0] sm:$0xff]  ;;  %v366_v8 = vld [vmem:[%s549_s3 + $0x18] sm:$0xff]  ;;  %v365_v9 = vld [vmem:[%s549_s3 + $0x10] sm:$0xff] }
   0x9   :  { %v45_v5 = vpack.c.bf16 %v44_v3, %v44_v3  ;;  %v367_v7 = vld [vmem:[%s549_s3 + $0x20] sm:$0xff]  ;;  %v364_v10 = vld [vmem:[%s549_s3 + $0x8] sm:$0xff]  ;;  %v378_v12 = vld [vmem:[%s551_s5 + $0x38] sm:$0xff] }
   0xa   :  { %v363_v11 = vld [vmem:[%s549_s3] sm:$0xff]  ;;  %256 = vmatpush.bf16.msra.mxu2 %v378_v12  ;;  %v377_v13 = vld [vmem:[%s551_s5 + $0x30] sm:$0xff]  ;;  %v376_v15 = vld [vmem:[%s551_s5 + $0x28] sm:$0xff] }
   0xb   :  { %73 = vmatpush.bf16.msra.mxu0 %v361_v2  ;;  %160 = vmatpush.bf16.msra.mxu1 %v369_v4  ;;  %v80_v14 = vld [vmem:[%s548_s2] sm:$0x1]  ;;  %v374_v30 = vld [vmem:[%s551_s5 + $0x18] sm:$0xff]  ;;  %v373_v31 = vld [vmem:[%s551_s5 + $0x10] sm:$0xff] }
   0xc   :  { %v82_v16 = vpack.i.b16 %v80_v14, %v80_v14  ;;  %v375_v17 = vld [vmem:[%s551_s5 + $0x20] sm:$0xff]  ;;  %v372_v32 = vld [vmem:[%s551_s5 + $0x8] sm:$0xff] }
   0xd   :  { %v371_v33 = vld [vmem:[%s551_s5] sm:$0xff] }
   0xe   :  { %296 = vmatmul.msk.bf16.vlgmr.msra.gmra.mxu0 %vm62_vm0, %v45_v5  ;;  %257 = vmatpush.bf16.msra.mxu2 %v377_v13  ;;  %v84_v18 = vperm.slane %v82_v16, 0  ;;  %v173_v34 = vld [vmem:[%s550_s4] sm:$0x1]  ;;  %s276_s4 = sshll.u32 %s439_s18, 4  ;;  %s277_s4 = int_to_ptr.vmem [resolvable:$true] %s276_s4 }
   0xf   :  { %161 = vmatpush.bf16.msra.mxu1 %v368_v6  ;;  %v175_v35 = vpack.i.b16 %v173_v34, %v173_v34  ;;  %v383_v48 = vld [vmem:[%s552_s6] ss:$0 sm:$0xff] }
  0x10   :  { %v86_v21 = vunpack.c.l.bf16 %v84_v18 }
  0x11   :  { %v177_v36 = vperm.slane %v175_v35, 0 }
  0x12   :  { %258 = vmatpush.bf16.msra.mxu2 %v376_v15 }
  0x13   :  { %162 = vmatpush.bf16.msra.mxu1 %v367_v7  ;;  %v179_v39 = vunpack.c.l.bf16 %v177_v36 }
  0x16   :  { %259 = vmatpush.bf16.msra.mxu2 %v375_v17 }
  0x17   :  { %163 = vmatpush.bf16.msra.mxu1 %v366_v8 }
  0x1a   :  { %260 = vmatpush.bf16.msra.mxu2 %v374_v30 }
  0x1b   :  { %164 = vmatpush.bf16.msra.mxu1 %v365_v9 }
  0x1e   :  { %261 = vmatpush.bf16.msra.mxu2 %v373_v31 }
  0x1f   :  { %165 = vmatpush.bf16.msra.mxu1 %v364_v10 }
  0x22   :  { %262 = vmatpush.bf16.msra.mxu2 %v372_v32 }
  0x23   :  { %166 = vmatpush.bf16.msra.mxu1 %v363_v11 }
  0x26   :  { %263 = vmatpush.bf16.msra.mxu2 %v371_v33 }
  0x8b   :  { %v75_v19 = vpop.f32.mrf.mxu0 }
  0x8c   :  { %v79_v20 = vpack.c.bf16 %v75_v19, %v75_v19 }
  0x8e   :  { %v85_v22 = vunpack.c.l.bf16 %v79_v20 }
  0x90   :  { %v87_v23 = vadd.f32 %v86_v21, %v85_v22 }
  0x92   :  { %v88_v24 = vpack.c.bf16 %v87_v23, %v87_v23 }
  0x93   :  { %v77_v25 = vpop.f32.mrf.mxu0 }
  0x94   :  { %v89_v26 = vunpack.c.l.bf16 %v88_v24 }
  0x96   :  { %v90_v27 = vmul.f32 0.20019531, %v89_v26 }
  0x98   :  { %v93_v28 = vmax.f32 %v89_v26, %v90_v27 }
  0x9a   :  { %v94_v29 = vpack.c.bf16 %v93_v28, %v93_v28 }
  0x9c   :  { %167 = vmatmul.bf16.vlgmr.msra.gmra.mxu1 %v94_v29 }
 0x119   :  { %v168_v37 = vpop.f32.mrf.mxu1 }
 0x11a   :  { %v172_v38 = vpack.c.bf16 %v168_v37, %v168_v37 }
 0x11c   :  { %v178_v40 = vunpack.c.l.bf16 %v172_v38 }
 0x11e   :  { %v180_v41 = vadd.f32 %v179_v39, %v178_v40 }
 0x120   :  { %v181_v42 = vpack.c.bf16 %v180_v41, %v180_v41 }
 0x121   :  { %v170_v43 = vpop.f32.mrf.mxu1 }
 0x122   :  { %v182_v44 = vunpack.c.l.bf16 %v181_v42 }
 0x124   :  { %v183_v45 = vmul.f32 0.20019531, %v182_v44 }
 0x126   :  { %v186_v46 = vmax.f32 %v182_v44, %v183_v45 }
 0x128   :  { %v187_v47 = vpack.c.bf16 %v186_v46, %v186_v46 }
 0x12a   :  { %264 = vmatmul.bf16.vlgmr.msra.gmra.mxu2 %v187_v47 }
 0x1ad   :  { %v265_v49 = vpop.f32.mrf.mxu2 }
 0x1ae   :  { %v266_v50 = vadd.f32 %v383_v48, %v265_v49 }
 0x1b0   :  { %270 = vst.msk [vmem:[#allocation5] sm:$0xff] %vm269_vm1, %v266_v50 }
 0x1b1   :  { %281 = dma.vmem_to_hbm [thread:$0]  %s277_s4, 128, %s279_s21, [#allocation4]  }
 0x1b5   :  { %v267_v51 = vpop.f32.mrf.mxu2 }
 0x1b6   :  { %434 = dma.done.wait [#allocation4], 128  }
 0x1b7   :  { %435 = vsyncadd [#allocation4], 4294967168 }
 0x1b8   :  { %286 = vsyncpa [#allocation3], 1 }
 0x1b9   :  { %287 = vsyncpa [#allocation4], 1 }

</bundles_post_ra>
